<compile_context>
chip_gen: v5e
topology: v5e:2x2
jax: 0.10.0
libtpu: 0.0.40
codegen_flags: <defaults>
</compile_context>

<pallas_src>
import jax
import jax.numpy as jnp
from jax import lax
from jax.experimental import pallas as pl
from jax.experimental.pallas import tpu as pltpu

IN_LOGICAL = 5
IN_PADDED = 8          # feature dim padded for aligned DMA rows
OUT_LOGICAL = 104
LANES = 128            # internal lane-dense width for every layer
NEG_BIG = -1e30        # pad bias for the final layer -> padded logits exp to 0
ROW_CHUNK = 256        # in-kernel sub-chunk of the batch tile (vreg-pressure control)


def _mlp_softmax_kernel(x_ref, w1_ref, w2_ref, w3_ref, w4_ref, b_ref, o_ref):
    tb = x_ref.shape[0]
    chunk = min(tb, ROW_CHUNK)
    nchunks = tb // chunk  # TB is always an exact multiple of chunk (see wrapper)

    def process(r0):
        x = x_ref[pl.ds(r0, chunk), :]                       # (chunk, 8) bf16

        # Linear(5,10) + ReLU   (bf16 MXU, f32 accumulate; padded lanes stay 0)
        h = jnp.dot(x, w1_ref[...],
                    preferred_element_type=jnp.float32) + b_ref[0:1, :]
        h = jnp.maximum(h, 0.0)

        # Linear(10,50) + ReLU
        h = jnp.dot(h.astype(jnp.bfloat16), w2_ref[...],
                    preferred_element_type=jnp.float32) + b_ref[1:2, :]
        h = jnp.maximum(h, 0.0)

        # Linear(50,100) + ReLU
        h = jnp.dot(h.astype(jnp.bfloat16), w3_ref[...],
                    preferred_element_type=jnp.float32) + b_ref[2:3, :]
        h = jnp.maximum(h, 0.0)

        # Dropout(p=0.3) is identity in eval mode.
        # Linear(100,104) padded to 128; pad bias is -1e30 so padded logits -> 0.
        logits = jnp.dot(h.astype(jnp.bfloat16), w4_ref[...],
                         preferred_element_type=jnp.float32) + b_ref[3:4, :]

        # Softmax over the (lane) feature axis; exact normalization in f32.
        m = jnp.max(logits, axis=-1, keepdims=True)
        e = jnp.exp(logits - m)
        s = jnp.sum(e, axis=-1, keepdims=True)
        probs = e / s

        o_ref[pl.ds(r0, chunk), :] = probs[:, :OUT_LOGICAL].astype(o_ref.dtype)

    if nchunks == 1:
        process(0)
    else:
        def body(c, carry):
            process(pl.multiple_of(c * chunk, chunk))
            return carry
        lax.fori_loop(0, nchunks, body, 0, unroll=True)


def _round_up(x, m):
    return ((x + m - 1) // m) * m


def _prepare_params(params):
    """Pad weights to lane-dense shapes (bf16) and pack biases into one f32 slab."""
    def pad_w(w, rows, cols):
        w = jnp.asarray(w, jnp.float32)
        return jnp.pad(w, ((0, rows - w.shape[0]),
                           (0, cols - w.shape[1]))).astype(jnp.bfloat16)

    w1 = pad_w(params["w1"], IN_PADDED, LANES)    # (5,10)   -> (8,128)
    w2 = pad_w(params["w2"], LANES, LANES)        # (10,50)  -> (128,128)
    w3 = pad_w(params["w3"], LANES, LANES)        # (50,100) -> (128,128)
    w4 = pad_w(params["w4"], LANES, LANES)        # (100,104)-> (128,128)

    bias = jnp.zeros((4, LANES), jnp.float32)
    bias = bias.at[0, :10].set(jnp.asarray(params["b1"], jnp.float32).reshape(-1))
    bias = bias.at[1, :50].set(jnp.asarray(params["b2"], jnp.float32).reshape(-1))
    bias = bias.at[2, :100].set(jnp.asarray(params["b3"], jnp.float32).reshape(-1))
    b4 = jnp.full((LANES,), NEG_BIG, jnp.float32).at[:OUT_LOGICAL].set(
        jnp.asarray(params["b4"], jnp.float32).reshape(-1))
    bias = bias.at[3, :].set(b4)
    return w1, w2, w3, w4, bias


def modl_forward(feat, params, tb=1024):
    """Eval-mode forward of Modl as a single batch-tiled Pallas kernel.

    feat: (B, 5) float32.  Returns (B, 104) float32 softmax probabilities.
    """
    B = feat.shape[0]

    # Pre-cast + pad the input in the wrapper (removes per-tile in-kernel cast).
    x = jnp.pad(feat.astype(jnp.float32),
                ((0, 0), (0, IN_PADDED - IN_LOGICAL))).astype(jnp.bfloat16)
    w1, w2, w3, w4, bias = _prepare_params(params)

    # Batch tile: full batch for small B; otherwise ~B/2 rounded to ROW_CHUNK
    # (capped by tb) so the "parallel" grid axis has >= 2 steps (both v7x TCs busy)
    # while staying large enough to amortize per-step overhead on v5e/v6e.
    if B <= ROW_CHUNK:
        TB = B
    else:
        TB = min(_round_up(tb, ROW_CHUNK),
                 _round_up(pl.cdiv(B, 2), ROW_CHUNK))
    grid = (pl.cdiv(B, TB),)

    const = lambda arr: pl.BlockSpec(arr.shape, lambda i: (0, 0))
    in_specs = [
        pl.BlockSpec((TB, IN_PADDED), lambda i: (i, 0)),   # batch-tiled input
        const(w1), const(w2), const(w3), const(w4), const(bias),
    ]
    out_specs = pl.BlockSpec((TB, OUT_LOGICAL), lambda i: (i, 0))
    out_shape = jax.ShapeDtypeStruct((B, OUT_LOGICAL), jnp.float32)

    flops = 2 * B * (5 * 10 + 10 * 50 + 50 * 100 + 100 * OUT_LOGICAL)
    transcendentals = B * LANES
    weight_bytes = 2 * (IN_PADDED + 3 * LANES) * LANES + 4 * 4 * LANES
    bytes_accessed = B * IN_PADDED * 2 + B * OUT_LOGICAL * 4 + weight_bytes

    return pl.pallas_call(
        _mlp_softmax_kernel,
        out_shape=out_shape,
        grid=grid,
        in_specs=in_specs,
        out_specs=out_specs,
        compiler_params=pltpu.CompilerParams(
            dimension_semantics=("parallel",)),
        cost_estimate=pl.CostEstimate(
            flops=flops,
            transcendentals=transcendentals,
            bytes_accessed=bytes_accessed),
    )(x, w1, w2, w3, w4, bias)


def init_params(key):
    """Deterministic init mimicking nn.Linear's uniform(-1/sqrt(fan_in), 1/sqrt(fan_in)).
    Weights stored as (in_features, out_features) so the forward is x @ W + b."""
    dims = [(5, 10), (10, 50), (50, 100), (100, 104)]
    params = {}
    for i, (fin, fout) in enumerate(dims, start=1):
        kw, kb, key = jax.random.split(key, 3)
        bound = 1.0 / jnp.sqrt(jnp.float32(fin))
        params[f"w{i}"] = jax.random.uniform(
            kw, (fin, fout), jnp.float32, minval=-bound, maxval=bound)
        params[f"b{i}"] = jax.random.uniform(
            kb, (1, fout), jnp.float32, minval=-bound, maxval=bound)
    return params


def _reference_forward(feat, params):
    h = jnp.maximum(feat @ params["w1"] + params["b1"], 0.0)
    h = jnp.maximum(h @ params["w2"] + params["b2"], 0.0)
    h = jnp.maximum(h @ params["w3"] + params["b3"], 0.0)
    logits = h @ params["w4"] + params["b4"]
    return jax.nn.softmax(logits, axis=-1)


if __name__ == "__main__":
    key = jax.random.PRNGKey(0)
    kx, kx2, kp = jax.random.split(key, 3)
    params = init_params(kp)

    # Small primary check (single block, single in-kernel chunk).
    B = 8
    feat = jax.random.normal(kx, (B, IN_LOGICAL), dtype=jnp.float32)
    out = jax.block_until_ready(modl_forward(feat, params))
    assert out.shape == (B, OUT_LOGICAL)
    assert bool(jnp.allclose(jnp.sum(out, axis=-1), 1.0, atol=1e-4))
    assert bool(jnp.allclose(out, _reference_forward(feat, params), atol=2e-2))

    # Secondary check exercising the multi-block grid, the unrolled in-kernel
    # sub-chunk loop, and a partial last block (B % TB != 0).
    B2 = 520
    feat2 = jax.random.normal(kx2, (B2, IN_LOGICAL), dtype=jnp.float32)
    out2 = jax.block_until_ready(modl_forward(feat2, params))
    assert out2.shape == (B2, OUT_LOGICAL)
    assert bool(jnp.allclose(jnp.sum(out2, axis=-1), 1.0, atol=1e-4))
    assert bool(jnp.allclose(out2, _reference_forward(feat2, params), atol=2e-2))

    print("KERNEL_OK")
</pallas_src>

<mosaic_0001>
module attributes {stable_mosaic.version = 11 : i64} {
  func.func @_mlp_softmax_kernel(%arg0: i32, %arg1: memref<8x8xbf16, #tpu.memory_space<vmem>>, %arg2: memref<8x128xbf16, #tpu.memory_space<vmem>>, %arg3: memref<128x128xbf16, #tpu.memory_space<vmem>>, %arg4: memref<128x128xbf16, #tpu.memory_space<vmem>>, %arg5: memref<128x128xbf16, #tpu.memory_space<vmem>>, %arg6: memref<4x128xf32, #tpu.memory_space<vmem>>, %arg7: memref<8x104xf32, #tpu.memory_space<vmem>>) attributes {dimension_semantics = [#tpu.dimension_semantics<parallel>], iteration_bounds = array<i64: 1>, scalar_prefetch = 0 : i64, scratch_operands = 0 : i64, tpu.core_type = #tpu.core_type<tc>, window_params = [{transform_indices = @transform_0, window_bounds = array<i64: 8, 8>}, {pipeline_mode = #tpu.pipeline_mode<synchronous>, transform_indices = @transform_1, window_bounds = array<i64: 8, 128>}, {pipeline_mode = #tpu.pipeline_mode<synchronous>, transform_indices = @transform_2, window_bounds = array<i64: 128, 128>}, {pipeline_mode = #tpu.pipeline_mode<synchronous>, transform_indices = @transform_3, window_bounds = array<i64: 128, 128>}, {pipeline_mode = #tpu.pipeline_mode<synchronous>, transform_indices = @transform_4, window_bounds = array<i64: 128, 128>}, {pipeline_mode = #tpu.pipeline_mode<synchronous>, transform_indices = @transform_5, window_bounds = array<i64: 4, 128>}, {transform_indices = @transform_6, window_bounds = array<i64: 8, 104>}]} {
    %c0 = arith.constant 0 : index
    %c0_0 = arith.constant 0 : index
    %0 = vector.load %arg1[%c0, %c0_0] : memref<8x8xbf16, #tpu.memory_space<vmem>>, vector<8x8xbf16>
    %c0_1 = arith.constant 0 : index
    %c0_2 = arith.constant 0 : index
    %1 = vector.load %arg2[%c0_1, %c0_2] : memref<8x128xbf16, #tpu.memory_space<vmem>>, vector<8x128xbf16>
    %cst = arith.constant dense<0.000000e+00> : vector<8x128xf32>
    %2 = tpu.matmul %0, %1, %cst {dimension_numbers = #tpu.dot_dimension_numbers<[1], [0], [0], [1], [0, 0, 1, 1], [], []>} : vector<8x8xbf16>, vector<8x128xbf16>, vector<8x128xf32> -> vector<8x128xf32>
    %c0_3 = arith.constant 0 : index
    %c0_4 = arith.constant 0 : index
    %3 = vector.load %arg6[%c0_3, %c0_4] : memref<4x128xf32, #tpu.memory_space<vmem>>, vector<1x128xf32>
    %4 = vector.broadcast %3 : vector<1x128xf32> to vector<8x128xf32>
    %5 = arith.addf %2, %4 : vector<8x128xf32>
    %cst_5 = arith.constant 0.000000e+00 : f32
    %6 = vector.broadcast %cst_5 : f32 to vector<8x128xf32>
    %7 = arith.maximumf %5, %6 : vector<8x128xf32>
    %8 = arith.truncf %7 : vector<8x128xf32> to vector<8x128xbf16>
    %c0_6 = arith.constant 0 : index
    %c0_7 = arith.constant 0 : index
    %9 = vector.load %arg3[%c0_6, %c0_7] : memref<128x128xbf16, #tpu.memory_space<vmem>>, vector<128x128xbf16>
    %cst_8 = arith.constant dense<0.000000e+00> : vector<8x128xf32>
    %10 = tpu.matmul %8, %9, %cst_8 {dimension_numbers = #tpu.dot_dimension_numbers<[1], [0], [0], [1], [0, 0, 1, 1], [], []>} : vector<8x128xbf16>, vector<128x128xbf16>, vector<8x128xf32> -> vector<8x128xf32>
    %c1 = arith.constant 1 : index
    %c0_9 = arith.constant 0 : index
    %11 = vector.load %arg6[%c1, %c0_9] : memref<4x128xf32, #tpu.memory_space<vmem>>, vector<1x128xf32>
    %12 = vector.broadcast %11 : vector<1x128xf32> to vector<8x128xf32>
    %13 = arith.addf %10, %12 : vector<8x128xf32>
    %cst_10 = arith.constant 0.000000e+00 : f32
    %14 = vector.broadcast %cst_10 : f32 to vector<8x128xf32>
    %15 = arith.maximumf %13, %14 : vector<8x128xf32>
    %16 = arith.truncf %15 : vector<8x128xf32> to vector<8x128xbf16>
    %c0_11 = arith.constant 0 : index
    %c0_12 = arith.constant 0 : index
    %17 = vector.load %arg4[%c0_11, %c0_12] : memref<128x128xbf16, #tpu.memory_space<vmem>>, vector<128x128xbf16>
    %cst_13 = arith.constant dense<0.000000e+00> : vector<8x128xf32>
    %18 = tpu.matmul %16, %17, %cst_13 {dimension_numbers = #tpu.dot_dimension_numbers<[1], [0], [0], [1], [0, 0, 1, 1], [], []>} : vector<8x128xbf16>, vector<128x128xbf16>, vector<8x128xf32> -> vector<8x128xf32>
    %c2 = arith.constant 2 : index
    %c0_14 = arith.constant 0 : index
    %19 = vector.load %arg6[%c2, %c0_14] : memref<4x128xf32, #tpu.memory_space<vmem>>, vector<1x128xf32>
    %20 = vector.broadcast %19 : vector<1x128xf32> to vector<8x128xf32>
    %21 = arith.addf %18, %20 : vector<8x128xf32>
    %cst_15 = arith.constant 0.000000e+00 : f32
    %22 = vector.broadcast %cst_15 : f32 to vector<8x128xf32>
    %23 = arith.maximumf %21, %22 : vector<8x128xf32>
    %24 = arith.truncf %23 : vector<8x128xf32> to vector<8x128xbf16>
    %c0_16 = arith.constant 0 : index
    %c0_17 = arith.constant 0 : index
    %25 = vector.load %arg5[%c0_16, %c0_17] : memref<128x128xbf16, #tpu.memory_space<vmem>>, vector<128x128xbf16>
    %cst_18 = arith.constant dense<0.000000e+00> : vector<8x128xf32>
    %26 = tpu.matmul %24, %25, %cst_18 {dimension_numbers = #tpu.dot_dimension_numbers<[1], [0], [0], [1], [0, 0, 1, 1], [], []>} : vector<8x128xbf16>, vector<128x128xbf16>, vector<8x128xf32> -> vector<8x128xf32>
    %c3 = arith.constant 3 : index
    %c0_19 = arith.constant 0 : index
    %27 = vector.load %arg6[%c3, %c0_19] : memref<4x128xf32, #tpu.memory_space<vmem>>, vector<1x128xf32>
    %28 = vector.broadcast %27 : vector<1x128xf32> to vector<8x128xf32>
    %29 = arith.addf %26, %28 : vector<8x128xf32>
    %cst_20 = arith.constant dense<0xFF800000> : vector<8xf32>
    %30 = vector.multi_reduction <maximumf>, %29, %cst_20 [1] : vector<8x128xf32> to vector<8xf32>
    %31 = vector.shape_cast %30 : vector<8xf32> to vector<8x1xf32>
    %32 = vector.broadcast %31 : vector<8x1xf32> to vector<8x128xf32>
    %33 = arith.subf %29, %32 : vector<8x128xf32>
    %34 = math.exp %33 : vector<8x128xf32>
    %cst_21 = arith.constant dense<0.000000e+00> : vector<8xf32>
    %35 = vector.multi_reduction <add>, %34, %cst_21 [1] : vector<8x128xf32> to vector<8xf32>
    %36 = vector.shape_cast %35 : vector<8xf32> to vector<8x1xf32>
    %37 = vector.broadcast %36 : vector<8x1xf32> to vector<8x128xf32>
    %38 = arith.divf %34, %37 : vector<8x128xf32>
    %39 = vector.extract_strided_slice %38 {offsets = [0, 0], sizes = [8, 104], strides = [1, 1]} : vector<8x128xf32> to vector<8x104xf32>
    %c0_22 = arith.constant 0 : index
    %c0_23 = arith.constant 0 : index
    %40 = vector.load %arg7[%c0_22, %c0_23] : memref<8x104xf32, #tpu.memory_space<vmem>>, vector<8x104xf32>
    tpu.vector_store %arg7[%c0_22, %c0_23], %39 {strides = array<i32>} : memref<8x104xf32, #tpu.memory_space<vmem>>, vector<8x104xf32>,
    return
  }
  func.func @transform_0(%arg0: i32) -> (i32, i32) {
    %c0_i32 = arith.constant 0 : i32
    %c0_i32_0 = arith.constant 0 : i32
    return %arg0, %c0_i32 : i32, i32
  }
  func.func @transform_1(%arg0: i32) -> (i32, i32) {
    %c0_i32 = arith.constant 0 : i32
    %c0_i32_0 = arith.constant 0 : i32
    %c0_i32_1 = arith.constant 0 : i32
    return %c0_i32, %c0_i32_0 : i32, i32
  }
  func.func @transform_2(%arg0: i32) -> (i32, i32) {
    %c0_i32 = arith.constant 0 : i32
    %c0_i32_0 = arith.constant 0 : i32
    %c0_i32_1 = arith.constant 0 : i32
    return %c0_i32, %c0_i32_0 : i32, i32
  }
  func.func @transform_3(%arg0: i32) -> (i32, i32) {
    %c0_i32 = arith.constant 0 : i32
    %c0_i32_0 = arith.constant 0 : i32
    %c0_i32_1 = arith.constant 0 : i32
    return %c0_i32, %c0_i32_0 : i32, i32
  }
  func.func @transform_4(%arg0: i32) -> (i32, i32) {
    %c0_i32 = arith.constant 0 : i32
    %c0_i32_0 = arith.constant 0 : i32
    %c0_i32_1 = arith.constant 0 : i32
    return %c0_i32, %c0_i32_0 : i32, i32
  }
  func.func @transform_5(%arg0: i32) -> (i32, i32) {
    %c0_i32 = arith.constant 0 : i32
    %c0_i32_0 = arith.constant 0 : i32
    %c0_i32_1 = arith.constant 0 : i32
    return %c0_i32, %c0_i32_0 : i32, i32
  }
  func.func @transform_6(%arg0: i32) -> (i32, i32) {
    %c0_i32 = arith.constant 0 : i32
    %c0_i32_0 = arith.constant 0 : i32
    return %arg0, %c0_i32 : i32, i32
  }
}

</mosaic_0001>

<bundles_post_ra>
// kernel: tpu_custom_call.1
= control target key start
LH: loop header
LB: loop body
LE: loop exit
PB: predicated region body
PF: predicated region fallthrough
CT: control target
= control target key end

     0   :  { %11 = vsyncpa [#allocation3], 0  ;;  %s772_s0 = inlined_call_operand.hbm [shape: bf16[8,8], index: 0, kind: input, shape index: {}]   ;;  %s773_s1 = inlined_call_operand.hbm [shape: bf16[8,128], index: 1, kind: input, shape index: {}]   ;;  %s774_s2 = inlined_call_operand.hbm [shape: bf16[128,128], index: 2, kind: input, shape index: {}]   ;;  %s775_s3 = inlined_call_operand.hbm [shape: bf16[128,128], index: 3, kind: input, shape index: {}]   ;;  %s776_s4 = inlined_call_operand.hbm [shape: bf16[128,128], index: 4, kind: input, shape index: {}]   ;;  %s777_s5 = inlined_call_operand.vmem [shape: f32[4,128], index: 5, kind: input, shape index: {}]   ;;  %s778_s6 = inlined_call_operand.hbm [shape: f32[8,104], index: 6, kind: output, shape index: {}]  }
   0x1   :  { %12 = vsyncpa [#allocation6], 0 }
   0x2   :  { %13 = vsyncpa [#allocation9], 0  ;;  %s31_s23 = sshll.u32 %s773_s1, 4  ;;  %s32_s23 = int_to_ptr.hbm [resolvable:$true] %s31_s23 }
   0x3   :  { %14 = vsyncpa [#allocation4], 0  ;;  %s699_s24 = smov [#allocation5]   ;;  %s54_s28 = sshll.u32 %s775_s3, 4  ;;  %s55_s28 = int_to_ptr.hbm [resolvable:$true] %s54_s28 }
   0x4   :  { %s33_s25 = sshll.u32 %s699_s24, 4  ;;  %s700_s29 = smov [#allocation8]   ;;  %s34_s25 = int_to_ptr.vmem [resolvable:$true] %s33_s25 }
   0x5   :  { %36 = dma.hbm_to_vmem [thread:$0]  %s32_s23, 64, %s34_s25, [#allocation6]  }
   0x6   :  { %s56_s30 = sshll.u32 %s700_s29, 4  ;;  %s20_s9 = sshll.u32 %s772_s0, 4  ;;  %s57_s30 = int_to_ptr.vmem [resolvable:$true] %s56_s30  ;;  %s21_s9 = int_to_ptr.hbm [resolvable:$true] %s20_s9 }
   0x7   :  { %s701_s1 = smov 64   ;;  %s702_s10 = smov 4  }
   0x8   :  { %62 = dma.hbm_to_vmem [thread:$0]  %s55_s28, 1024, %s57_s30, [#allocation9], %s701_s1, %s701_s1, %s702_s10  }
   0x9   :  { %s41_s13 = sshll.u32 %s774_s2, 4  ;;  %s703_s14 = smov [#allocation2]   ;;  %s42_s13 = int_to_ptr.hbm [resolvable:$true] %s41_s13 }
   0xa   :  { %s22_s15 = sshll.u32 %s703_s14, 4  ;;  %s704_s3 = smov [#allocation7]   ;;  %s23_s15 = int_to_ptr.vmem [resolvable:$true] %s22_s15 }
   0xb   :  { %25 = dma.hbm_to_vmem [thread:$0]  %s21_s9, 64, %s23_s15, [#allocation3]  }
   0xc   :  { %s43_s16 = sshll.u32 %s704_s3, 4  ;;  %s67_s0 = sshll.u32 %s776_s4, 4  ;;  %s44_s16 = int_to_ptr.vmem [resolvable:$true] %s43_s16  ;;  %s68_s0 = int_to_ptr.hbm [resolvable:$true] %s67_s0 }
   0xd   :  { %49 = dma.hbm_to_vmem [thread:$0]  %s42_s13, 1024, %s44_s16, [#allocation6], %s701_s1, %s701_s1, %s702_s10  }
   0xe   :  { %s705_s19 = smov [#allocation10]  }
   0xf   :  { %s69_s20 = sshll.u32 %s705_s19, 4  ;;  %s70_s20 = int_to_ptr.vmem [resolvable:$true] %s69_s20 }
  0x10   :  { %75 = dma.hbm_to_vmem [thread:$0]  %s68_s0, 1024, %s70_s20, [#allocation9], %s701_s1, %s701_s1, %s702_s10  }
  0x11   :  { %691 = dma.done.wait [#allocation3], 64  }
  0x12   :  { %692 = vsyncadd [#allocation3], 4294967232 }
  0x13   :  { %693 = dma.done.wait [#allocation6], 1088  }
  0x14   :  { %694 = vsyncadd [#allocation6], 4294966208 }
  0x15   :  { %695 = dma.done.wait [#allocation9], 2048  }
  0x16   :  { %696 = vsyncadd [#allocation9], 4294965248  ;;  %vm107_vm0 = vcmask 1043456   ;;  %v100_v0 = vld [vmem:[#allocation5] sm:$0xf]  ;;  %vm103_vm1 = vcmask 64512  }
  0x17   :  { %v514_v1 = vld [vmem:[#allocation7 + $0x38] sm:$0xff]  ;;  %v109_v2 = vsel %vm107_vm0, %v100_v0, 0  ;;  %v513_v4 = vld [vmem:[#allocation7 + $0x30] sm:$0xff]  ;;  %v512_v5 = vld [vmem:[#allocation7 + $0x28] sm:$0xff]  ;;  %s398_s30 = sshll.u32 %s778_s6, 4  ;;  %vm389_vm6 = vcmask 850944   ;;  %s399_s30 = int_to_ptr.hbm [resolvable:$true] %s398_s30 }
  0x18   :  { %118 = vmatpush.bf16.msra.mxu0 %v109_v2  ;;  %v99_v3 = vld [vmem:[#allocation2] sm:$0xf]  ;;  %192 = vmatpush.bf16.msra.mxu1 %v514_v1  ;;  %v511_v6 = vld [vmem:[#allocation7 + $0x20] sm:$0xff]  ;;  %v509_v8 = vld [vmem:[#allocation7 + $0x10] sm:$0xff] }
  0x19   :  { %v510_v7 = vld [vmem:[#allocation7 + $0x18] sm:$0xff]  ;;  %v508_v9 = vld [vmem:[#allocation7 + $0x8] sm:$0xff]  ;;  %v507_v10 = vld [vmem:[#allocation7] sm:$0xff] }
  0x1a   :  { %v522_v11 = vld [vmem:[#allocation8 + $0x38] sm:$0xff]  ;;  %v521_v12 = vld [vmem:[#allocation8 + $0x30] sm:$0xff]  ;;  %v520_v13 = vld [vmem:[#allocation8 + $0x28] sm:$0xff] }
  0x1b   :  { %410 = vmatmul.msk.bf16.vlgmr.msra.gmra.mxu0 %vm103_vm1, %v99_v3  ;;  %273 = vmatpush.bf16.msra.mxu2 %v522_v11  ;;  %v519_v14 = vld [vmem:[#allocation8 + $0x20] sm:$0xff]  ;;  %v518_v15 = vld [vmem:[#allocation8 + $0x18] sm:$0xff]  ;;  %v517_v16 = vld [vmem:[#allocation8 + $0x10] sm:$0xff] }
  0x1c   :  { %193 = vmatpush.bf16.msra.mxu1 %v513_v4  ;;  %v539_v17 = vld [vmem:[%s777_s5] ss:$0 sm:$0xff]  ;;  %v516_v23 = vld [vmem:[#allocation8 + $0x8] sm:$0xff]  ;;  %v515_v24 = vld [vmem:[#allocation8] sm:$0xff] }
  0x1d   :  { %v530_v25 = vld [vmem:[#allocation10 + $0x38] sm:$0xff]  ;;  %v529_v26 = vld [vmem:[#allocation10 + $0x30] sm:$0xff]  ;;  %v528_v27 = vld [vmem:[#allocation10 + $0x28] sm:$0xff] }
  0x1e   :  { %354 = vmatpush.bf16.msra.mxu3 %v530_v25  ;;  %v527_v28 = vld [vmem:[#allocation10 + $0x20] sm:$0xff]  ;;  %v526_v29 = vld [vmem:[#allocation10 + $0x18] sm:$0xff]  ;;  %v525_v30 = vld [vmem:[#allocation10 + $0x10] sm:$0xff] }
  0x1f   :  { %274 = vmatpush.bf16.msra.mxu2 %v521_v12  ;;  %v540_v31 = vld [vmem:[%s777_s5 + $0x1] ss:$0 sm:$0xff]  ;;  %v524_v37 = vld [vmem:[#allocation10 + $0x8] sm:$0xff]  ;;  %v523_v38 = vld [vmem:[#allocation10] sm:$0xff] }
  0x20   :  { %194 = vmatpush.bf16.msra.mxu1 %v512_v5  ;;  %v541_v39 = vld [vmem:[%s777_s5 + $0x2] ss:$0 sm:$0xff]  ;;  %v542_v45 = vld [vmem:[%s777_s5 + $0x3] ss:$0 sm:$0xff]  ;;  %s706_s5 = smov [#allocation11]  }
  0x21   :  { %s396_s27 = sshll.u32 %s706_s5, 4  ;;  %s397_s27 = int_to_ptr.vmem [resolvable:$true] %s396_s27 }
  0x22   :  { %355 = vmatpush.bf16.msra.mxu3 %v529_v26 }
  0x23   :  { %275 = vmatpush.bf16.msra.mxu2 %v520_v13 }
  0x24   :  { %195 = vmatpush.bf16.msra.mxu1 %v511_v6 }
  0x26   :  { %356 = vmatpush.bf16.msra.mxu3 %v528_v27 }
  0x27   :  { %276 = vmatpush.bf16.msra.mxu2 %v519_v14 }
  0x28   :  { %196 = vmatpush.bf16.msra.mxu1 %v510_v7 }
  0x2a   :  { %357 = vmatpush.bf16.msra.mxu3 %v527_v28 }
  0x2b   :  { %277 = vmatpush.bf16.msra.mxu2 %v518_v15 }
  0x2c   :  { %197 = vmatpush.bf16.msra.mxu1 %v509_v8 }
  0x2e   :  { %358 = vmatpush.bf16.msra.mxu3 %v526_v29 }
  0x2f   :  { %278 = vmatpush.bf16.msra.mxu2 %v517_v16 }
  0x30   :  { %198 = vmatpush.bf16.msra.mxu1 %v508_v9 }
  0x32   :  { %359 = vmatpush.bf16.msra.mxu3 %v525_v30 }
  0x33   :  { %279 = vmatpush.bf16.msra.mxu2 %v516_v23 }
  0x34   :  { %199 = vmatpush.bf16.msra.mxu1 %v507_v10 }
  0x36   :  { %360 = vmatpush.bf16.msra.mxu3 %v524_v37 }
  0x37   :  { %280 = vmatpush.bf16.msra.mxu2 %v515_v24 }
  0x3a   :  { %361 = vmatpush.bf16.msra.mxu3 %v523_v38 }
  0x98   :  { %v120_v18 = vpop.f32.mrf.mxu0 }
  0x99   :  { %v121_v19 = vadd.f32 %v539_v17, %v120_v18 }
  0x9b   :  { %v124_v20 = vmax.f32 %v121_v19, 0.0 }
  0x9d   :  { %v125_v21 = vpack.c.bf16 %v124_v20, %v124_v20 }
  0x9f   :  { %200 = vmatmul.bf16.vlgmr.msra.gmra.mxu1 %v125_v21 }
  0xa0   :  { %v122_v22 = vpop.f32.mrf.mxu0 }
 0x11c   :  { %v201_v32 = vpop.f32.mrf.mxu1 }
 0x11d   :  { %v202_v33 = vadd.f32 %v540_v31, %v201_v32 }
 0x11f   :  { %v205_v34 = vmax.f32 %v202_v33, 0.0 }
 0x121   :  { %v206_v35 = vpack.c.bf16 %v205_v34, %v205_v34 }
 0x123   :  { %281 = vmatmul.bf16.vlgmr.msra.gmra.mxu2 %v206_v35 }
 0x124   :  { %v203_v36 = vpop.f32.mrf.mxu1 }
 0x1a6   :  { %v282_v40 = vpop.f32.mrf.mxu2 }
 0x1a7   :  { %v283_v41 = vadd.f32 %v541_v39, %v282_v40 }
 0x1a9   :  { %v286_v42 = vmax.f32 %v283_v41, 0.0 }
 0x1ab   :  { %v287_v43 = vpack.c.bf16 %v286_v42, %v286_v42 }
 0x1ad   :  { %362 = vmatmul.bf16.vlgmr.msra.gmra.mxu3 %v287_v43 }
 0x1ae   :  { %v284_v44 = vpop.f32.mrf.mxu2 }
 0x230   :  { %v363_v46 = vpop.f32.mrf.mxu3 }
 0x231   :  { %v364_v47 = vadd.f32 %v542_v45, %v363_v46 }
 0x233   :  { %367 = vmax.xlane.f32.xlu0 %v364_v47 }
 0x238   :  { %v365_v48 = vpop.f32.mrf.mxu3 }
 0x2a6   :  { %v368_v49 = vpop.xlane.xlu0 %367 }
 0x2a7   :  { %v369_v50 = vsub.f32 %v364_v47, %v368_v49 }
 0x2a9   :  { %v370_v51 = vmul.f32 1.442695, %v369_v50 }
 0x2ab   :  { %543 = vpow2.f32 %v370_v51 }
 0x2b1   :  { %v544_v52 = vpop.eup %543 }
 0x2b2   :  { %372 = vadd.xlane.f32.xlu0 %v544_v52 }
 0x325   :  { %v373_v53 = vpop.xlane.xlu0 %372 }
 0x326   :  { %545 = vrcp.f32 %v373_v53  ;;  %v385_v57 = vand.u32 2147483648, %v373_v53  ;;  %v383_v59 = vand.u32 2147483647, %v373_v53  ;;  %vm379_vm3 = vweird.f32 %v373_v53 }
 0x328   :  { %v386_v61 = vor.u32 1.1754944e-38, %v385_v57  ;;  %vm384_vm5 = vcmp.eq.f32.partialorder %v383_v59, 8.507059e+37 }
 0x32c   :  { %v546_v54 = vpop.eup %545 }
 0x32d   :  { %v375_v55 = vmul.f32 %v546_v54, %v373_v53  ;;  %vm380_vm2 = vweird.f32 %v546_v54 }
 0x32e   :  { %vm381_vm4 = vmor %vm379_vm3, %vm380_vm2 }
 0x32f   :  { %v376_v56 = vsub.f32 1.0, %v375_v55 }
 0x331   :  { %v377_v58 = vmul.f32 %v546_v54, %v376_v56 }
 0x333   :  { %v378_v60 = vadd.f32 %v546_v54, %v377_v58 }
 0x335   :  { %v382_v62 = vsel %vm381_vm4, %v546_v54, %v378_v60 }
 0x336   :  { %v387_v63 = vsel %vm384_vm5, %v386_v61, %v382_v62 }
 0x337   :  { %v388_v0 = vmul.f32 %v544_v52, %v387_v63 }
 0x339   :  { %390 = vst.msk [vmem:[#allocation11] sm:$0xff] %vm389_vm6, %v388_v0 }
 0x33a   :  { %401 = dma.vmem_to_hbm [thread:$0]  %s397_s27, 128, %s399_s30, [#allocation4]  }
 0x33b   :  { %697 = dma.done.wait [#allocation4], 128  }
 0x33c   :  { %698 = vsyncadd [#allocation4], 4294967168 }
 0x33d   :  { %406 = vsyncpa [#allocation3], 1 }
 0x33e   :  { %407 = vsyncpa [#allocation6], 1 }
 0x33f   :  { %408 = vsyncpa [#allocation9], 1 }
 0x340   :  { %409 = vsyncpa [#allocation4], 1 }

</bundles_post_ra>
